<compile_context>
chip_gen: v7x
topology: tpu7x:2x2x1
jax: 0.10.0
libtpu: 0.0.40
codegen_flags: <defaults>
</compile_context>

<pallas_src>
import math

import jax
import jax.numpy as jnp
from jax.experimental import pallas as pl
from jax.experimental.pallas import tpu as pltpu


def _blend_kernel(inputs_ref, mask_ref, orig_ref, out_ref):
    x = inputs_ref[...]
    m = mask_ref[...]
    o = orig_ref[...]
    # Literal module formula (bit-exact); VPU has huge slack, HBM is the limit.
    out_ref[...] = m * x + (1 - m) * o


def _cdiv(a, b):
    return -(-a // b)


def _choose_view(shape, n):
    """Pick a 2-D (R, C) view of the flattened data. Never requires padding."""
    last = shape[-1] if len(shape) else 1
    if last > 0 and last % 128 == 0:
        return n // last, last                      # layout-preserving, lane-dense
    for lane in (1024, 512, 256, 128):
        if n % lane == 0:
            return n // lane, lane                  # lane-dense flat view
    return n // last, last                          # layout-preserving fallback


def baseline_concept_corrector(
    inputs,
    already_intervened_concepts,
    original_predictions,
    *,
    max_block_bytes: int = 2 * 1024 * 1024,   # 2 MiB/buffer -> 16 MiB resident (fits v7x)
    target_row_steps: int = 8,                # keep the DMA pipeline fed / both v7x TCs busy
):
    """Elementwise blend; all args share shape and dtype."""
    assert inputs.shape == already_intervened_concepts.shape == original_predictions.shape
    assert inputs.dtype == already_intervened_concepts.dtype == original_predictions.dtype

    orig_shape = inputs.shape
    dtype = inputs.dtype
    itemsize = jnp.dtype(dtype).itemsize
    n = math.prod(orig_shape)
    if n == 0:
        return inputs  # empty tensor: nothing to compute

    R, C = _choose_view(orig_shape, n)
    view = (R, C)

    # --- tile selection ------------------------------------------------------
    if C * 8 * itemsize > max_block_bytes:
        bc = max(128, ((max_block_bytes // (8 * itemsize)) // 128) * 128)
    else:
        bc = C  # full-extent last dim always satisfies the (8,128) rule
    max_br = max(8, ((max_block_bytes // (bc * itemsize)) // 8) * 8)
    if R <= 8:
        br = R  # single full-extent block; no per-step overhead for tiny inputs
    else:
        br = _cdiv(R, target_row_steps)
        br = ((br + 7) // 8) * 8
        br = min(br, max_br)
    grid = (_cdiv(R, br), _cdiv(C, bc))   # partial last blocks masked by Pallas

    x2 = inputs.reshape(view)
    m2 = already_intervened_concepts.reshape(view)
    o2 = original_predictions.reshape(view)

    spec = pl.BlockSpec((br, bc), lambda i, j: (i, j))

    out2 = pl.pallas_call(
        _blend_kernel,
        out_shape=jax.ShapeDtypeStruct(view, dtype),
        grid=grid,
        in_specs=[spec, spec, spec],
        out_specs=spec,
        compiler_params=pltpu.CompilerParams(
            dimension_semantics=("parallel", "parallel"),
            vmem_limit_bytes=32 << 20,
        ),
        cost_estimate=pl.CostEstimate(
            flops=3 * n, transcendentals=0, bytes_accessed=4 * n * itemsize
        ),
    )(x2, m2, o2)

    return out2.reshape(orig_shape)


if __name__ == "__main__":
    key = jax.random.PRNGKey(0)

    def reference(x, m, o):
        # already_intervened * inputs + (1 - already_intervened) * original
        return m * x + (1 - m) * o

    # Small shapes:
    #   (2, 8, 32)  -> module-typical (batch=2, seq=8, concepts=32); lane-dense flat path
    #   (4, 7, 384) -> last dim multiple of 128; multi-step grid w/ partial last block
    #   (5, 33, 37) -> odd element count; layout-preserving fallback w/ partial block
    for shp in [(2, 8, 32), (4, 7, 384), (5, 33, 37)]:
        k1, k2, k3, key = jax.random.split(key, 4)
        x = jax.random.normal(k1, shp, dtype=jnp.float32)
        o = jax.random.normal(k2, shp, dtype=jnp.float32)
        m = jax.random.bernoulli(k3, 0.3, shp).astype(jnp.float32)

        out = jax.block_until_ready(baseline_concept_corrector(x, m, o))
        ref = reference(x, m, o)

        assert out.shape == shp and out.dtype == x.dtype
        assert jnp.allclose(out, ref, atol=1e-6, rtol=1e-6), f"mismatch vs reference for {shp}"

    print("KERNEL_OK")
</pallas_src>

<mosaic_0001>
module attributes {stable_mosaic.version = 11 : i64} {
  func.func @_blend_kernel(%arg0: i32, %arg1: i32, %arg2: memref<1x512xf32, #tpu.memory_space<vmem>>, %arg3: memref<1x512xf32, #tpu.memory_space<vmem>>, %arg4: memref<1x512xf32, #tpu.memory_space<vmem>>, %arg5: memref<1x512xf32, #tpu.memory_space<vmem>>) attributes {dimension_semantics = [#tpu.dimension_semantics<parallel>, #tpu.dimension_semantics<parallel>], iteration_bounds = array<i64: 1, 1>, scalar_prefetch = 0 : i64, scratch_operands = 0 : i64, tpu.core_type = #tpu.core_type<tc>, window_params = [{transform_indices = @transform_0, window_bounds = array<i64: 1, 512>}, {transform_indices = @transform_1, window_bounds = array<i64: 1, 512>}, {transform_indices = @transform_2, window_bounds = array<i64: 1, 512>}, {transform_indices = @transform_3, window_bounds = array<i64: 1, 512>}]} {
    %c0 = arith.constant 0 : index
    %c0_0 = arith.constant 0 : index
    %0 = vector.load %arg2[%c0, %c0_0] : memref<1x512xf32, #tpu.memory_space<vmem>>, vector<1x512xf32>
    %c0_1 = arith.constant 0 : index
    %c0_2 = arith.constant 0 : index
    %1 = vector.load %arg3[%c0_1, %c0_2] : memref<1x512xf32, #tpu.memory_space<vmem>>, vector<1x512xf32>
    %c0_3 = arith.constant 0 : index
    %c0_4 = arith.constant 0 : index
    %2 = vector.load %arg4[%c0_3, %c0_4] : memref<1x512xf32, #tpu.memory_space<vmem>>, vector<1x512xf32>
    %3 = arith.mulf %1, %0 : vector<1x512xf32>
    %cst = arith.constant 1.000000e+00 : f32
    %4 = vector.broadcast %cst : f32 to vector<1x512xf32>
    %5 = arith.subf %4, %1 : vector<1x512xf32>
    %6 = arith.mulf %5, %2 : vector<1x512xf32>
    %7 = arith.addf %3, %6 : vector<1x512xf32>
    %c0_5 = arith.constant 0 : index
    %c0_6 = arith.constant 0 : index
    %8 = vector.load %arg5[%c0_5, %c0_6] : memref<1x512xf32, #tpu.memory_space<vmem>>, vector<1x512xf32>
    tpu.vector_store %arg5[%c0_5, %c0_6], %7 {strides = array<i32>} : memref<1x512xf32, #tpu.memory_space<vmem>>, vector<1x512xf32>,
    return
  }
  func.func @transform_0(%arg0: i32, %arg1: i32) -> (i32, i32) {
    %c0_i32 = arith.constant 0 : i32
    return %arg0, %arg1 : i32, i32
  }
  func.func @transform_1(%arg0: i32, %arg1: i32) -> (i32, i32) {
    %c0_i32 = arith.constant 0 : i32
    return %arg0, %arg1 : i32, i32
  }
  func.func @transform_2(%arg0: i32, %arg1: i32) -> (i32, i32) {
    %c0_i32 = arith.constant 0 : i32
    return %arg0, %arg1 : i32, i32
  }
  func.func @transform_3(%arg0: i32, %arg1: i32) -> (i32, i32) {
    %c0_i32 = arith.constant 0 : i32
    return %arg0, %arg1 : i32, i32
  }
}

</mosaic_0001>

<bundles_post_ra>
// kernel: tpu_custom_call.1
= control target key start
LH: loop header
LB: loop body
LE: loop exit
PB: predicated region body
PF: predicated region fallthrough
CT: control target
= control target key end

     0   :  { %8 = vsyncpa [#allocation3], 0  ;;  %s204_s0 = inlined_call_operand.hbm [shape: f32[1,512], index: 0, kind: input, shape index: {}]   ;;  %s205_s1 = inlined_call_operand.hbm [shape: f32[1,512], index: 1, kind: input, shape index: {}]   ;;  %s206_s2 = inlined_call_operand.vmem [shape: f32[1,512], index: 2, kind: input, shape index: {}]   ;;  %s207_s3 = inlined_call_operand.hbm [shape: f32[1,512], index: 3, kind: output, shape index: {}]  }
   0x1   :  { %9 = vsyncpa [#allocation6], 0 }
   0x2   :  { %10 = vsyncpa [#allocation4], 0  ;;  %s142_s12 = smov [#allocation2]   ;;  %s143_s14 = smov [#allocation5]  }
   0x3   :  { %s17_s13 = sshll.u32 %s142_s12, 4  ;;  %s27_s15 = sshll.u32 %s143_s14, 4  ;;  %s18_s13 = int_to_ptr.vmem [resolvable:$true] %s17_s13  ;;  %s28_s15 = int_to_ptr.vmem [resolvable:$true] %s27_s15 }
   0x4   :  { %s70_s18 = scalar_lea.hbm %s204_s0, 64 }
   0x5   :  { %p71_p0 = scmp.ne.s32.totalorder %s204_s0, %s70_s18  ;;  %p74_p1 = scmp.lt.u32.totalorder %s70_s18, %s204_s0 }
   0x7   :  { %p76_p2 = pnand %p74_p1, %p71_p0 }
   0x9   :  { %79 = shalt.err (!%p76_p2)
}
   0xa   :  { %s80_s23 = scalar_lea.vmem %s18_s13, 64  ;;  %p85_p4 = scmp.lt.s32.totalorder %s18_s13, %s18_s13 }
   0xb   :  { %p81_p3 = scmp.ne.s32.totalorder %s18_s13, %s80_s23  ;;  %p86_p5 = scmp.lt.s32.totalorder %s80_s23, %s80_s23 }
   0xd   :  { %p87_p6 = por %p86_p5, %p85_p4 }
   0xf   :  { %p88_p7 = pnand %p87_p6, %p81_p3 }
  0x11   :  { %91 = shalt.err (!%p88_p7)
}
  0x12   :  { %20 = dma.hbm_to_vmem [thread:$0]  %s204_s0, 64, %s18_s13, [#allocation3]  }
  0x13   :  { %s92_s28 = scalar_lea.hbm %s205_s1, 64 }
  0x14   :  { %p93_p8 = scmp.ne.s32.totalorder %s205_s1, %s92_s28  ;;  %p96_p9 = scmp.lt.u32.totalorder %s92_s28, %s205_s1 }
  0x16   :  { %p98_p10 = pnand %p96_p9, %p93_p8 }
  0x18   :  { %101 = shalt.err (!%p98_p10)
}
  0x19   :  { %s102_s6 = scalar_lea.vmem %s28_s15, 64  ;;  %p107_p12 = scmp.lt.s32.totalorder %s28_s15, %s28_s15 }
  0x1a   :  { %p103_p11 = scmp.ne.s32.totalorder %s28_s15, %s102_s6  ;;  %p108_p13 = scmp.lt.s32.totalorder %s102_s6, %s102_s6 }
  0x1c   :  { %p109_p0 = por %p108_p13, %p107_p12 }
  0x1e   :  { %p110_p1 = pnand %p109_p0, %p103_p11 }
  0x20   :  { %113 = shalt.err (!%p110_p1)
}
  0x21   :  { %30 = dma.hbm_to_vmem [thread:$0]  %s205_s1, 64, %s28_s15, [#allocation6]  }
  0x22   :  { %136 = dma.done.wait [#allocation3], 64  }
  0x23   :  { %137 = vsyncadd [#allocation3], 4294967232 }
  0x24   :  { %138 = dma.done.wait [#allocation6], 64  }
  0x25   :  { %139 = vsyncadd [#allocation6], 4294967232  ;;  %v39_v0 = vld [vmem:[#allocation2] sm:$0xf]  ;;  %v40_v1 = vld [vmem:[#allocation5] sm:$0xf]  ;;  %v46_v3 = vlaneseq }
  0x26   :  { %v41_v2 = vld [vmem:[%s206_s2] sm:$0xf]  ;;  %v42_v4 = vmul.f32 %v40_v1, %v39_v0  ;;  %v43_v5 = vsub.f32 1.0, %v40_v1  ;;  %s144_s10 = smov [#allocation7]  }
  0x27   :  { %s57_s11 = sshll.u32 %s144_s10, 4  ;;  %vm48_vm0 = vcmp.lt.s32.totalorder %v46_v3, 512  ;;  %s58_s11 = int_to_ptr.vmem [resolvable:$true] %s57_s11 }
  0x28   :  { %v44_v6 = vmul.f32 %v43_v5, %v41_v2  ;;  %s114_s1 = scalar_lea.vmem %s58_s11, 64  ;;  %p119_p3 = scmp.lt.s32.totalorder %s58_s11, %s58_s11 }
  0x29   :  { %p115_p2 = scmp.ne.s32.totalorder %s58_s11, %s114_s1  ;;  %p120_p4 = scmp.lt.s32.totalorder %s114_s1, %s114_s1 }
  0x2a   :  { %v45_v7 = vadd.f32 %v44_v6, %v42_v4 }
  0x2b   :  { %p121_p5 = por %p120_p4, %p119_p3 }
  0x2c   :  { %50 = vst.msk [vmem:[#allocation7] sm:$0xf] %vm48_vm0, %v45_v7 }
  0x2d   :  { %p122_p6 = pnand %p121_p5, %p115_p2 }
  0x2f   :  { %125 = shalt.err (!%p122_p6)
}
  0x30   :  { %s126_s2 = scalar_lea.hbm %s207_s3, 64 }
  0x31   :  { %p127_p7 = scmp.ne.s32.totalorder %s207_s3, %s126_s2  ;;  %p130_p8 = scmp.lt.u32.totalorder %s126_s2, %s207_s3 }
  0x33   :  { %p132_p9 = pnand %p130_p8, %p127_p7 }
  0x35   :  { %135 = shalt.err (!%p132_p9)
}
  0x36   :  { %60 = dma.vmem_to_hbm [thread:$0]  %s58_s11, 64, %s207_s3, [#allocation4]  }
  0x37   :  { %140 = dma.done.wait [#allocation4], 64  }
  0x38   :  { %141 = vsyncadd [#allocation4], 4294967232 }
  0x39   :  { %64 = vsyncpa [#allocation3], 1 }
  0x3a   :  { %65 = vsyncpa [#allocation6], 1 }
  0x3b   :  { %66 = vsyncpa [#allocation4], 1 }

</bundles_post_ra>
